<compile_context>
chip_gen: v7x
topology: tpu7x:2x2x1
jax: 0.10.0
libtpu: 0.0.40
codegen_flags: <defaults>
</compile_context>

<pallas_src>
import jax
import jax.numpy as jnp
import numpy as np
from jax.experimental import pallas as pl
from jax.experimental.pallas import tpu as pltpu


def _round_up(x: int, m: int) -> int:
    return ((x + m - 1) // m) * m


def _make_actor_kernel(num_linear: int):
    """Build a fused MLP-actor kernel for `num_linear` Linear layers.

    Ref order (inputs):  obs, w_0, b_0, ..., w_{L-1}, b_{L-1}, std, eps
    Ref order (outputs): a, mu
    """

    def kernel(*refs):
        obs_ref = refs[0]
        wb_refs = refs[1 : 1 + 2 * num_linear]
        std_ref = refs[1 + 2 * num_linear]
        eps_ref = refs[2 + 2 * num_linear]
        a_ref = refs[3 + 2 * num_linear]
        mu_ref = refs[4 + 2 * num_linear]

        h = obs_ref[...].astype(jnp.float32)
        for li in range(num_linear):
            w = wb_refs[2 * li][...].astype(jnp.float32)
            b = wb_refs[2 * li + 1][...].astype(jnp.float32)
            h = jnp.dot(h, w, preferred_element_type=jnp.float32) + b
            if li < num_linear - 1:
                h = jnp.tanh(h)  # hidden activation (nn.Tanh); output_activation = Identity
        mu = h
        a = mu + std_ref[...].astype(jnp.float32) * eps_ref[...].astype(jnp.float32)
        mu_ref[...] = mu.astype(mu_ref.dtype)
        a_ref[...] = a.astype(a_ref.dtype)

    return kernel


def init_mlp_actor_params(key, obs_dim, act_dim, hid_sizes, log_std_init):
    """Deterministic init matching the PyTorch module's parameter shapes."""
    sizes = [obs_dim] + list(hid_sizes) + [act_dim]
    weights, biases = [], []
    for j in range(len(sizes) - 1):
        key, wk, bk = jax.random.split(key, 3)
        bound = 1.0 / np.sqrt(sizes[j])  # torch.nn.Linear default init range
        weights.append(
            jax.random.uniform(wk, (sizes[j], sizes[j + 1]), jnp.float32, -bound, bound)
        )
        biases.append(jax.random.uniform(bk, (sizes[j + 1],), jnp.float32, -bound, bound))
    log_std = jnp.full((act_dim,), float(log_std_init), dtype=jnp.float32)
    return {"weights": weights, "biases": biases, "log_std": log_std}


def mlp_actor_forward(obs, params, key, *, batch_tile=256):
    """Returns (a, mu, std): sampled action, mean, std — same values as the torch forward."""
    weights = params["weights"]
    biases = params["biases"]
    log_std = params["log_std"]
    num_linear = len(weights)
    act_dim = weights[-1].shape[1]

    B, obs_dim = obs.shape
    # Hoisted out of the kernel: computed once, broadcast via a resident (1, act_dim) block.
    std = jnp.exp(log_std.astype(jnp.float32))
    # Reparameterized sample noise (a = mu + std * eps ~ Normal(mu, std)).
    eps = jax.random.normal(key, (B, act_dim), dtype=jnp.float32)

    # Batch tile: multiple of 8 sublanes, capped so per-tile VMEM stays tiny on all chips.
    tb = _round_up(min(batch_tile, _round_up(B, 8)), 8)
    b_pad = _round_up(B, tb)
    if b_pad != B:
        obs = jnp.pad(obs, ((0, b_pad - B), (0, 0)))
        eps = jnp.pad(eps, ((0, b_pad - B), (0, 0)))
    grid = (b_pad // tb,)

    def const_spec(shape):
        return pl.BlockSpec(shape, lambda i: (0, 0))

    in_specs = [pl.BlockSpec((tb, obs_dim), lambda i: (i, 0))]
    operands = [obs]
    for w, b in zip(weights, biases):
        in_specs.append(const_spec(w.shape))
        operands.append(w)
        in_specs.append(const_spec((1, b.shape[0])))
        operands.append(b.reshape(1, -1))
    in_specs.append(const_spec((1, act_dim)))
    operands.append(std.reshape(1, -1))
    in_specs.append(pl.BlockSpec((tb, act_dim), lambda i: (i, 0)))
    operands.append(eps)

    out_specs = (
        pl.BlockSpec((tb, act_dim), lambda i: (i, 0)),
        pl.BlockSpec((tb, act_dim), lambda i: (i, 0)),
    )
    out_shape = (
        jax.ShapeDtypeStruct((b_pad, act_dim), obs.dtype),
        jax.ShapeDtypeStruct((b_pad, act_dim), obs.dtype),
    )

    a_pad, mu_pad = pl.pallas_call(
        _make_actor_kernel(num_linear),
        grid=grid,
        in_specs=in_specs,
        out_specs=out_specs,
        out_shape=out_shape,
        compiler_params=pltpu.CompilerParams(dimension_semantics=("parallel",)),
    )(*operands)

    a = a_pad[:B]
    mu = mu_pad[:B]
    # TODO(synk): the torch.distributions Normal/Independent object `pi` has no Pallas
    # equivalent; its sample() is reproduced via a = mu + std * eps above.
    return a, mu, std


if __name__ == "__main__":
    key = jax.random.PRNGKey(0)
    pkey, okey, skey = jax.random.split(key, 3)

    obs_dim, act_dim, hid_sizes = 32, 8, (64, 64)
    batch = 8
    params = init_mlp_actor_params(pkey, obs_dim, act_dim, hid_sizes, log_std_init=-0.5)
    obs = jax.random.normal(okey, (batch, obs_dim), dtype=jnp.float32)

    a, mu, std = mlp_actor_forward(obs, params, skey)
    jax.block_until_ready((a, mu, std))

    # Pure-JAX reference (same eps draw so the sample matches exactly in distribution path).
    h = obs
    for li, (w, b) in enumerate(zip(params["weights"], params["biases"])):
        h = h @ w + b
        if li < len(params["weights"]) - 1:
            h = jnp.tanh(h)
    mu_ref = h
    std_ref = jnp.exp(params["log_std"])
    eps_ref = jax.random.normal(skey, (batch, act_dim), dtype=jnp.float32)
    a_ref = mu_ref + std_ref * eps_ref

    assert jnp.allclose(mu, mu_ref, atol=1e-5, rtol=1e-5), "mu mismatch vs reference"
    assert jnp.allclose(std, std_ref, atol=1e-6, rtol=1e-6), "std mismatch vs reference"
    assert jnp.allclose(a, a_ref, atol=1e-5, rtol=1e-5), "sample mismatch vs reference"

    print("KERNEL_OK")
</pallas_src>

<mosaic_0001>
module attributes {stable_mosaic.version = 11 : i64} {
  func.func @kernel(%arg0: i32, %arg1: memref<8x32xf32, #tpu.memory_space<vmem>>, %arg2: memref<32x64xf32, #tpu.memory_space<vmem>>, %arg3: memref<1x64xf32, #tpu.memory_space<vmem>>, %arg4: memref<64x64xf32, #tpu.memory_space<vmem>>, %arg5: memref<1x64xf32, #tpu.memory_space<vmem>>, %arg6: memref<64x8xf32, #tpu.memory_space<vmem>>, %arg7: memref<1x8xf32, #tpu.memory_space<vmem>>, %arg8: memref<1x8xf32, #tpu.memory_space<vmem>>, %arg9: memref<8x8xf32, #tpu.memory_space<vmem>>, %arg10: memref<8x8xf32, #tpu.memory_space<vmem>>, %arg11: memref<8x8xf32, #tpu.memory_space<vmem>>) attributes {dimension_semantics = [#tpu.dimension_semantics<parallel>], iteration_bounds = array<i64: 1>, scalar_prefetch = 0 : i64, scratch_operands = 0 : i64, tpu.core_type = #tpu.core_type<tc>, window_params = [{transform_indices = @transform_0, window_bounds = array<i64: 8, 32>}, {pipeline_mode = #tpu.pipeline_mode<synchronous>, transform_indices = @transform_1, window_bounds = array<i64: 32, 64>}, {pipeline_mode = #tpu.pipeline_mode<synchronous>, transform_indices = @transform_2, window_bounds = array<i64: 1, 64>}, {pipeline_mode = #tpu.pipeline_mode<synchronous>, transform_indices = @transform_3, window_bounds = array<i64: 64, 64>}, {pipeline_mode = #tpu.pipeline_mode<synchronous>, transform_indices = @transform_4, window_bounds = array<i64: 1, 64>}, {pipeline_mode = #tpu.pipeline_mode<synchronous>, transform_indices = @transform_5, window_bounds = array<i64: 64, 8>}, {pipeline_mode = #tpu.pipeline_mode<synchronous>, transform_indices = @transform_6, window_bounds = array<i64: 1, 8>}, {pipeline_mode = #tpu.pipeline_mode<synchronous>, transform_indices = @transform_7, window_bounds = array<i64: 1, 8>}, {transform_indices = @transform_8, window_bounds = array<i64: 8, 8>}, {transform_indices = @transform_9, window_bounds = array<i64: 8, 8>}, {transform_indices = @transform_10, window_bounds = array<i64: 8, 8>}]} {
    %c0 = arith.constant 0 : index
    %c0_0 = arith.constant 0 : index
    %0 = vector.load %arg1[%c0, %c0_0] : memref<8x32xf32, #tpu.memory_space<vmem>>, vector<8x32xf32>
    %c0_1 = arith.constant 0 : index
    %c0_2 = arith.constant 0 : index
    %1 = vector.load %arg2[%c0_1, %c0_2] : memref<32x64xf32, #tpu.memory_space<vmem>>, vector<32x64xf32>
    %c0_3 = arith.constant 0 : index
    %c0_4 = arith.constant 0 : index
    %2 = vector.load %arg3[%c0_3, %c0_4] : memref<1x64xf32, #tpu.memory_space<vmem>>, vector<1x64xf32>
    %cst = arith.constant dense<0.000000e+00> : vector<8x64xf32>
    %3 = tpu.matmul %0, %1, %cst {dimension_numbers = #tpu.dot_dimension_numbers<[1], [0], [0], [1], [0, 0, 1, 1], [], []>} : vector<8x32xf32>, vector<32x64xf32>, vector<8x64xf32> -> vector<8x64xf32>
    %4 = vector.broadcast %2 : vector<1x64xf32> to vector<8x64xf32>
    %5 = arith.addf %3, %4 : vector<8x64xf32>
    %6 = math.tanh %5 : vector<8x64xf32>
    %c0_5 = arith.constant 0 : index
    %c0_6 = arith.constant 0 : index
    %7 = vector.load %arg4[%c0_5, %c0_6] : memref<64x64xf32, #tpu.memory_space<vmem>>, vector<64x64xf32>
    %c0_7 = arith.constant 0 : index
    %c0_8 = arith.constant 0 : index
    %8 = vector.load %arg5[%c0_7, %c0_8] : memref<1x64xf32, #tpu.memory_space<vmem>>, vector<1x64xf32>
    %cst_9 = arith.constant dense<0.000000e+00> : vector<8x64xf32>
    %9 = tpu.matmul %6, %7, %cst_9 {dimension_numbers = #tpu.dot_dimension_numbers<[1], [0], [0], [1], [0, 0, 1, 1], [], []>} : vector<8x64xf32>, vector<64x64xf32>, vector<8x64xf32> -> vector<8x64xf32>
    %10 = vector.broadcast %8 : vector<1x64xf32> to vector<8x64xf32>
    %11 = arith.addf %9, %10 : vector<8x64xf32>
    %12 = math.tanh %11 : vector<8x64xf32>
    %c0_10 = arith.constant 0 : index
    %c0_11 = arith.constant 0 : index
    %13 = vector.load %arg6[%c0_10, %c0_11] : memref<64x8xf32, #tpu.memory_space<vmem>>, vector<64x8xf32>
    %c0_12 = arith.constant 0 : index
    %c0_13 = arith.constant 0 : index
    %14 = vector.load %arg7[%c0_12, %c0_13] : memref<1x8xf32, #tpu.memory_space<vmem>>, vector<1x8xf32>
    %cst_14 = arith.constant dense<0.000000e+00> : vector<8x8xf32>
    %15 = tpu.matmul %12, %13, %cst_14 {dimension_numbers = #tpu.dot_dimension_numbers<[1], [0], [0], [1], [0, 0, 1, 1], [], []>} : vector<8x64xf32>, vector<64x8xf32>, vector<8x8xf32> -> vector<8x8xf32>
    %16 = vector.broadcast %14 : vector<1x8xf32> to vector<8x8xf32>
    %17 = arith.addf %15, %16 : vector<8x8xf32>
    %c0_15 = arith.constant 0 : index
    %c0_16 = arith.constant 0 : index
    %18 = vector.load %arg8[%c0_15, %c0_16] : memref<1x8xf32, #tpu.memory_space<vmem>>, vector<1x8xf32>
    %c0_17 = arith.constant 0 : index
    %c0_18 = arith.constant 0 : index
    %19 = vector.load %arg9[%c0_17, %c0_18] : memref<8x8xf32, #tpu.memory_space<vmem>>, vector<8x8xf32>
    %20 = vector.broadcast %18 : vector<1x8xf32> to vector<8x8xf32>
    %21 = arith.mulf %20, %19 : vector<8x8xf32>
    %22 = arith.addf %17, %21 : vector<8x8xf32>
    %c0_19 = arith.constant 0 : index
    %c0_20 = arith.constant 0 : index
    %23 = vector.load %arg11[%c0_19, %c0_20] : memref<8x8xf32, #tpu.memory_space<vmem>>, vector<8x8xf32>
    tpu.vector_store %arg11[%c0_19, %c0_20], %17 {strides = array<i32>} : memref<8x8xf32, #tpu.memory_space<vmem>>, vector<8x8xf32>,
    %c0_21 = arith.constant 0 : index
    %c0_22 = arith.constant 0 : index
    %24 = vector.load %arg10[%c0_21, %c0_22] : memref<8x8xf32, #tpu.memory_space<vmem>>, vector<8x8xf32>
    tpu.vector_store %arg10[%c0_21, %c0_22], %22 {strides = array<i32>} : memref<8x8xf32, #tpu.memory_space<vmem>>, vector<8x8xf32>,
    return
  }
  func.func @transform_0(%arg0: i32) -> (i32, i32) {
    %c0_i32 = arith.constant 0 : i32
    %c0_i32_0 = arith.constant 0 : i32
    return %arg0, %c0_i32 : i32, i32
  }
  func.func @transform_1(%arg0: i32) -> (i32, i32) {
    %c0_i32 = arith.constant 0 : i32
    %c0_i32_0 = arith.constant 0 : i32
    %c0_i32_1 = arith.constant 0 : i32
    return %c0_i32, %c0_i32_0 : i32, i32
  }
  func.func @transform_2(%arg0: i32) -> (i32, i32) {
    %c0_i32 = arith.constant 0 : i32
    %c0_i32_0 = arith.constant 0 : i32
    %c0_i32_1 = arith.constant 0 : i32
    return %c0_i32, %c0_i32_0 : i32, i32
  }
  func.func @transform_3(%arg0: i32) -> (i32, i32) {
    %c0_i32 = arith.constant 0 : i32
    %c0_i32_0 = arith.constant 0 : i32
    %c0_i32_1 = arith.constant 0 : i32
    return %c0_i32, %c0_i32_0 : i32, i32
  }
  func.func @transform_4(%arg0: i32) -> (i32, i32) {
    %c0_i32 = arith.constant 0 : i32
    %c0_i32_0 = arith.constant 0 : i32
    %c0_i32_1 = arith.constant 0 : i32
    return %c0_i32, %c0_i32_0 : i32, i32
  }
  func.func @transform_5(%arg0: i32) -> (i32, i32) {
    %c0_i32 = arith.constant 0 : i32
    %c0_i32_0 = arith.constant 0 : i32
    %c0_i32_1 = arith.constant 0 : i32
    return %c0_i32, %c0_i32_0 : i32, i32
  }
  func.func @transform_6(%arg0: i32) -> (i32, i32) {
    %c0_i32 = arith.constant 0 : i32
    %c0_i32_0 = arith.constant 0 : i32
    %c0_i32_1 = arith.constant 0 : i32
    return %c0_i32, %c0_i32_0 : i32, i32
  }
  func.func @transform_7(%arg0: i32) -> (i32, i32) {
    %c0_i32 = arith.constant 0 : i32
    %c0_i32_0 = arith.constant 0 : i32
    %c0_i32_1 = arith.constant 0 : i32
    return %c0_i32, %c0_i32_0 : i32, i32
  }
  func.func @transform_8(%arg0: i32) -> (i32, i32) {
    %c0_i32 = arith.constant 0 : i32
    %c0_i32_0 = arith.constant 0 : i32
    return %arg0, %c0_i32 : i32, i32
  }
  func.func @transform_9(%arg0: i32) -> (i32, i32) {
    %c0_i32 = arith.constant 0 : i32
    %c0_i32_0 = arith.constant 0 : i32
    return %arg0, %c0_i32 : i32, i32
  }
  func.func @transform_10(%arg0: i32) -> (i32, i32) {
    %c0_i32 = arith.constant 0 : i32
    %c0_i32_0 = arith.constant 0 : i32
    return %arg0, %c0_i32 : i32, i32
  }
}

</mosaic_0001>

<bundles_post_ra>
// kernel: tpu_custom_call.1
= control target key start
LH: loop header
LB: loop body
LE: loop exit
PB: predicated region body
PF: predicated region fallthrough
CT: control target
= control target key end

     0   :  { %16 = vsyncpa [#allocation3], 0  ;;  %s732_s0 = inlined_call_operand.vmem [shape: f32[8,32], index: 0, kind: input, shape index: {}]   ;;  %s733_s1 = inlined_call_operand.hbm [shape: f32[32,64], index: 1, kind: input, shape index: {}]   ;;  %s734_s2 = inlined_call_operand.vmem [shape: f32[1,64], index: 2, kind: input, shape index: {}]   ;;  %s735_s3 = inlined_call_operand.vmem [shape: f32[64,64], index: 3, kind: input, shape index: {}]   ;;  %s736_s4 = inlined_call_operand.vmem [shape: f32[1,64], index: 4, kind: input, shape index: {}]   ;;  %s737_s5 = inlined_call_operand.vmem [shape: f32[64,8], index: 5, kind: input, shape index: {}]   ;;  %s738_s6 = inlined_call_operand.vmem [shape: f32[1,8], index: 6, kind: input, shape index: {}]   ;;  %s739_s7 = inlined_call_operand.vmem [shape: f32[1,8], index: 7, kind: input, shape index: {}]   ;;  %s740_s8 = inlined_call_operand.vmem [shape: f32[8,8], index: 8, kind: input, shape index: {}]   ;;  %s741_s9 = inlined_call_operand.hbm [shape: f32[8,8], index: 9, kind: output, shape index: {0}]   ;;  %s742_s10 = inlined_call_operand.hbm [shape: f32[8,8], index: 10, kind: output, shape index: {1}]  }
   0x1   :  { %17 = vsyncpa [#allocation4], 0 }
   0x2   :  { %18 = vsyncpa [#allocation7], 0  ;;  %s550_s13 = smov [#allocation2]   ;;  %s478_s17 = scalar_lea.hbm %s733_s1, 512 }
   0x3   :  { %s26_s14 = sshll.u32 %s550_s13, 4  ;;  %p479_p0 = scmp.ne.s32.totalorder %s733_s1, %s478_s17  ;;  %s27_s14 = int_to_ptr.vmem [resolvable:$true] %s26_s14 }
   0x4   :  { %p482_p1 = scmp.lt.u32.totalorder %s478_s17, %s733_s1 }
   0x6   :  { %p484_p2 = pnand %p482_p1, %p479_p0 }
   0x8   :  { %487 = shalt.err (!%p484_p2)
}
   0x9   :  { %s488_s22 = scalar_lea.vmem %s27_s14, 512  ;;  %p493_p4 = scmp.lt.s32.totalorder %s27_s14, %s27_s14 }
   0xa   :  { %p489_p3 = scmp.ne.s32.totalorder %s27_s14, %s488_s22  ;;  %p494_p5 = scmp.lt.s32.totalorder %s488_s22, %s488_s22 }
   0xc   :  { %p495_p6 = por %p494_p5, %p493_p4 }
   0xe   :  { %p496_p7 = pnand %p495_p6, %p489_p3 }
  0x10   :  { %499 = shalt.err (!%p496_p7)
}
  0x11   :  { %s551_s23 = smov 128   ;;  %s552_s24 = smov 8  }
  0x12   :  { %32 = dma.hbm_to_vmem [thread:$0]  %s733_s1, 512, %s27_s14, [#allocation3], %s551_s23, %s551_s23, %s552_s24  }
  0x13   :  { %544 = dma.done.wait [#allocation3], 512  }
  0x14   :  { %545 = vsyncadd [#allocation3], 4294966784  ;;  %v553_v0 = vmov 0.0|0.0   ;;  %vm554_vm0 = vmmov 0   ;;  %v555_v1 = vmov 0.0   ;;  %v51_v2 = vld [vmem:[#allocation2] sm:$0xff] }
  0x15   :  { %436 = vmatprep.subr.bf16.mxu0 %v553_v0  ;;  %395 = vmatprep.mubr.msk.f32.mxu0 %vm554_vm0, %v555_v1  ;;  %v52_v3 = vld [vmem:[#allocation2 + $0x8] sm:$0xff]  ;;  %v53_v4 = vld [vmem:[#allocation2 + $0x10] sm:$0xff]  ;;  %v54_v6 = vld [vmem:[#allocation2 + $0x18] sm:$0xff]  ;;  %vm62_vm1 = vcmask 261120   ;;  %vm152_vm2 = vcmask 523264   ;;  %vm325_vm3 = vcmask 64512  }
  0x16   :  { %442 = vmatprep.subr.bf16.mxu1 %v553_v0  ;;  %414 = vmatprep.mubr.msk.f32.mxu1 %vm554_vm0, %v555_v1  ;;  %v437_v5 = vpack.c.bf16 %v52_v3, %v51_v2  ;;  %v137_v7 = vld [vmem:[%s735_s3] sm:$0xff]  ;;  %v138_v8 = vld [vmem:[%s735_s3 + $0x8] sm:$0xff]  ;;  %v440_v9 = vpack.c.bf16 %v54_v6, %v53_v4  ;;  %v139_v12 = vld [vmem:[%s735_s3 + $0x10] sm:$0xff]  ;;  %s557_s25 = smov [#allocation5]  }
  0x17   :  { %v443_v10 = vpack.c.bf16 %v138_v8, %v137_v7  ;;  %v50_v11 = vld [vmem:[%s732_s0] sm:$0xff]  ;;  %v140_v13 = vld [vmem:[%s735_s3 + $0x18] sm:$0xff]  ;;  %v142_v16 = vld [vmem:[%s735_s3 + $0x28] sm:$0xff]  ;;  %s334_s26 = sshll.u32 %s557_s25, 4  ;;  %s335_s26 = int_to_ptr.vmem [resolvable:$true] %s334_s26 }
  0x18   :  { %438 = vmatpush3.bf16.msra.mxu0 %v437_v5  ;;  %v446_v14 = vpack.c.bf16 %v140_v13, %v139_v12  ;;  %v141_v15 = vld [vmem:[%s735_s3 + $0x20] sm:$0xff]  ;;  %v143_v18 = vld [vmem:[%s735_s3 + $0x30] sm:$0xff]  ;;  %v144_v19 = vld [vmem:[%s735_s3 + $0x38] sm:$0xff] }
  0x19   :  { %439 = vmatprep.subr.bf16.mxu0 %v553_v0  ;;  %444 = vmatpush3.bf16.msra.mxu1 %v443_v10  ;;  %v449_v17 = vpack.c.bf16 %v142_v16, %v141_v15  ;;  %v452_v20 = vpack.c.bf16 %v144_v19, %v143_v18  ;;  %v227_v21 = vld [vmem:[%s737_s5] sm:$0xff]  ;;  %v228_v22 = vld [vmem:[%s737_s5 + $0x8] sm:$0xff]  ;;  %v229_v29 = vld [vmem:[%s737_s5 + $0x10] sm:$0xff] }
  0x1a   :  { %445 = vmatprep.subr.bf16.mxu1 %v553_v0  ;;  %v455_v23 = vpack.c.bf16 %v228_v22, %v227_v21  ;;  %v357_v24 = vld [vmem:[%s734_s2] ss:$0 sm:$0xff]  ;;  %v230_v30 = vld [vmem:[%s737_s5 + $0x18] sm:$0xff]  ;;  %v232_v33 = vld [vmem:[%s737_s5 + $0x28] sm:$0xff] }
  0x1b   :  { %v458_v31 = vpack.c.bf16 %v230_v30, %v229_v29  ;;  %v231_v32 = vld [vmem:[%s737_s5 + $0x20] sm:$0xff]  ;;  %v233_v35 = vld [vmem:[%s737_s5 + $0x30] sm:$0xff]  ;;  %v234_v36 = vld [vmem:[%s737_s5 + $0x38] sm:$0xff] }
  0x1c   :  { %441 = vmatpush3.bf16.msra.mxu0 %v440_v9  ;;  %v461_v34 = vpack.c.bf16 %v232_v33, %v231_v32  ;;  %v464_v37 = vpack.c.bf16 %v234_v36, %v233_v35  ;;  %v359_v38 = vld [vmem:[%s736_s4] ss:$0 sm:$0xff]  ;;  %s556_s4 = smov [#allocation6]  }
  0x1d   :  { %454 = vmatprep.subr.bf16.mxu0 %v553_v0  ;;  %447 = vmatpush3.bf16.msra.mxu1 %v446_v14  ;;  %v363_v43 = vld [vmem:[%s739_s7] ss:$0 sm:$0xff]  ;;  %s344_s24 = sshll.u32 %s556_s4, 4  ;;  %s345_s24 = int_to_ptr.vmem [resolvable:$true] %s344_s24 }
  0x1e   :  { %448 = vmatprep.subr.bf16.mxu1 %v553_v0  ;;  %v316_v44 = vld [vmem:[%s740_s8] sm:$0xff]  ;;  %s500_s7 = scalar_lea.vmem %s345_s24, 128  ;;  %p505_p9 = scmp.lt.s32.totalorder %s345_s24, %s345_s24 }
  0x1f   :  { %396 = vmatmul.mubr.msk.f32.vlgmr.msra.gmra.mrb[0].mxu0 %vm62_vm1, %v50_v11  ;;  %v361_v45 = vld [vmem:[%s738_s6] ss:$0 sm:$0xff]  ;;  %v323_v46 = vmul.f32 %v363_v43, %v316_v44  ;;  %p501_p8 = scmp.ne.s32.totalorder %s345_s24, %s500_s7  ;;  %p506_p10 = scmp.lt.s32.totalorder %s500_s7, %s500_s7 }
  0x20   :  { %433 = vmatprep.mubr.msk.f32.mxu0 %vm554_vm0, %v555_v1  ;;  %456 = vmatpush3.bf16.msra.mxu0 %v455_v23 }
  0x21   :  { %450 = vmatpush3.bf16.msra.mxu1 %v449_v17  ;;  %457 = vmatprep.subr.bf16.mxu0 %v553_v0  ;;  %p507_p11 = por %p506_p10, %p505_p9 }
  0x22   :  { %451 = vmatprep.subr.bf16.mxu1 %v553_v0 }
  0x23   :  { %p508_p12 = pnand %p507_p11, %p501_p8 }
  0x24   :  { %459 = vmatpush3.bf16.msra.mxu0 %v458_v31 }
  0x25   :  { %453 = vmatpush3.bf16.msra.mxu1 %v452_v20  ;;  %460 = vmatprep.subr.bf16.mxu0 %v553_v0 }
  0x28   :  { %462 = vmatpush3.bf16.msra.mxu0 %v461_v34 }
  0x29   :  { %463 = vmatprep.subr.bf16.mxu0 %v553_v0 }
  0x2c   :  { %465 = vmatpush3.bf16.msra.mxu0 %v464_v37 }
  0xf2   :  { %v132_v25 = vpop.f32.mrb[0].mxu0 }
  0xf3   :  { %v133_v26 = vadd.f32 %v357_v24, %v132_v25  ;;  %v397_v27 = vpop.f32.mrb[1].mxu0 }
  0xf5   :  { %474 = vtanh.f32 %v133_v26 }
  0xff   :  { %v475_v28 = vpop.eup %474 }
 0x100   :  { %415 = vmatmul.mubr.msk.f32.vlgmr.msra.gmra.mrb[0].mxu1 %vm152_vm2, %v475_v28 }
 0x1d3   :  { %v222_v39 = vpop.f32.mrb[0].mxu1 }
 0x1d4   :  { %v223_v40 = vadd.f32 %v359_v38, %v222_v39  ;;  %v416_v41 = vpop.f32.mrb[1].mxu1 }
 0x1d6   :  { %476 = vtanh.f32 %v223_v40 }
 0x1e0   :  { %v477_v42 = vpop.eup %476 }
 0x1e1   :  { %434 = vmatmul.mubr.msk.f32.vlgmr.msra.gmra.mrb[2].mxu0 %vm152_vm2, %v477_v42 }
 0x2b4   :  { %v311_v47 = vpop.f32.mrb[2].mxu0 }
 0x2b5   :  { %v312_v48 = vadd.f32 %v361_v45, %v311_v47  ;;  %v435_v49 = vpop.f32.mrb[3].mxu0 }
 0x2b7   :  { %v324_v50 = vadd.f32 %v323_v46, %v312_v48  ;;  %326 = vst.msk [vmem:[#allocation6] sm:$0xff] %vm325_vm3, %v312_v48 }
 0x2b8   :  { %511 = shalt.err (!%p508_p12)
}
 0x2b9   :  { %s512_s27 = scalar_lea.hbm %s742_s10, 128 }
 0x2ba   :  { %p513_p13 = scmp.ne.s32.totalorder %s742_s10, %s512_s27  ;;  %p516_p0 = scmp.lt.u32.totalorder %s512_s27, %s742_s10 }
 0x2bc   :  { %p518_p1 = pnand %p516_p0, %p513_p13 }
 0x2be   :  { %521 = shalt.err (!%p518_p1)
}
 0x2bf   :  { %347 = dma.vmem_to_hbm [thread:$0]  %s345_s24, 128, %s742_s10, [#allocation7]   ;;  %327 = vst.msk [vmem:[#allocation5] sm:$0xff] %vm325_vm3, %v324_v50 }
 0x2c0   :  { %s522_s2 = scalar_lea.vmem %s335_s26, 128  ;;  %p527_p3 = scmp.lt.s32.totalorder %s335_s26, %s335_s26 }
 0x2c1   :  { %p523_p2 = scmp.ne.s32.totalorder %s335_s26, %s522_s2  ;;  %p528_p4 = scmp.lt.s32.totalorder %s522_s2, %s522_s2 }
 0x2c3   :  { %p529_p5 = por %p528_p4, %p527_p3 }
 0x2c5   :  { %p530_p6 = pnand %p529_p5, %p523_p2 }
 0x2c7   :  { %533 = shalt.err (!%p530_p6)
}
 0x2c8   :  { %s534_s14 = scalar_lea.hbm %s741_s9, 128 }
 0x2c9   :  { %p535_p7 = scmp.ne.s32.totalorder %s741_s9, %s534_s14  ;;  %p538_p8 = scmp.lt.u32.totalorder %s534_s14, %s741_s9 }
 0x2cb   :  { %p540_p9 = pnand %p538_p8, %p535_p7 }
 0x2cd   :  { %543 = shalt.err (!%p540_p9)
}
 0x2ce   :  { %337 = dma.vmem_to_hbm [thread:$0]  %s335_s26, 128, %s741_s9, [#allocation4]  }
 0x2cf   :  { %546 = dma.done.wait [#allocation4], 128  }
 0x2d0   :  { %547 = vsyncadd [#allocation4], 4294967168 }
 0x2d1   :  { %548 = dma.done.wait [#allocation7], 128  }
 0x2d2   :  { %549 = vsyncadd [#allocation7], 4294967168 }
 0x2d3   :  { %354 = vsyncpa [#allocation3], 1 }
 0x2d4   :  { %355 = vsyncpa [#allocation4], 1 }
 0x2d5   :  { %356 = vsyncpa [#allocation7], 1 }

</bundles_post_ra>
